<compile_context>
chip_gen: v7x
topology: tpu7x:2x2x1
jax: 0.10.0
libtpu: 0.0.40
codegen_flags: <defaults>
</compile_context>

<pallas_src>
import numpy as np
import jax
import jax.numpy as jnp
from jax.experimental import pallas as pl
from jax.experimental.pallas import tpu as pltpu


# ---------------------------------------------------------------------------
# Pallas kernel: whole forward pass in one grid step on [B*N, C] activations.
# ---------------------------------------------------------------------------
def _pred_flow_kernel(x_ref,            # [B*N, C]      folded embeddings
                      adp_ref,          # [B*N, B*N]    kron(I_B, adp^T)
                      skip_w_ref,       # [L, C, C]     skip 1x1-conv weights (C_in, C_out)
                      skip_b_ref,       # [L, 1, C]
                      gcn_w_ref,        # [L, 3C, C]    gcn mlp weights (row blocks: x, x1, x2)
                      gcn_b_ref,        # [L, 1, C]
                      bn_s_ref,         # [L, 1, C]     folded BN scale = gamma * rsqrt(var+eps)
                      bn_t_ref,         # [L, 1, C]     folded BN shift = beta - mean*scale
                      w1_ref, b1_ref,   # [C, C/2], [1, C/2]
                      w2_ref, b2_ref,   # [C/2, C/4], [1, C/4]
                      w3_ref, b3_ref,   # [C/4, C/8], [1, C/8]
                      w4_ref, b4_ref,   # [1, C/8], [1, 1]
                      out_ref):         # [1, B*N]      lane-dense output row
    x = x_ref[...]                       # [B*N, C]
    adp = adp_ref[...]                   # [B*N, B*N]
    C = x.shape[1]
    L = skip_w_ref.shape[0]

    skip = jnp.zeros_like(x)
    for i in range(L):                   # static (layers=3)
        residual = x

        # skip_convs[i] (1x1 conv)
        skip = skip + jnp.dot(x, skip_w_ref[i],
                              preferred_element_type=jnp.float32) + skip_b_ref[i]

        # graph propagation: x1 = A^T x, x2 = A^T A^T x  (per-batch via block-diag adp)
        x1 = jnp.dot(adp, x, preferred_element_type=jnp.float32)
        x2 = jnp.dot(adp, x1, preferred_element_type=jnp.float32)

        # gcn mlp on [x | x1 | x2]: three K=C matmuls summed (no lane concat)
        h = (jnp.dot(x,  gcn_w_ref[i, 0:C, :],       preferred_element_type=jnp.float32)
             + jnp.dot(x1, gcn_w_ref[i, C:2 * C, :], preferred_element_type=jnp.float32)
             + jnp.dot(x2, gcn_w_ref[i, 2 * C:3 * C, :],
                       preferred_element_type=jnp.float32)
             + gcn_b_ref[i])
        # dropout: identity (eval)

        x = h + residual
        # BatchNorm2d (eval), pre-folded to scale/shift
        x = x * bn_s_ref[i] + bn_t_ref[i]

    x = jnp.maximum(skip, 0.0)           # relu(skip)

    def lrelu(v):                        # nn.LeakyReLU default slope 0.01
        return jnp.where(v > 0, v, 0.01 * v)

    h = lrelu(jnp.dot(x, w1_ref[...], preferred_element_type=jnp.float32) + b1_ref[...])
    h = lrelu(jnp.dot(h, w2_ref[...], preferred_element_type=jnp.float32) + b2_ref[...])
    h = lrelu(jnp.dot(h, w3_ref[...], preferred_element_type=jnp.float32) + b3_ref[...])

    # final 1-channel projection: broadcast-multiply + lane reduce, lane-dense store
    val = jnp.sum(h * w4_ref[...], axis=-1)          # [B*N]
    val = val[None, :] + b4_ref[...]                 # [1, B*N]
    out_ref[...] = jnp.maximum(val, 0.0)             # outer relu


# ---------------------------------------------------------------------------
# Wrapper
# ---------------------------------------------------------------------------
def prediction_layer_flow(embeddings, params):
    """embeddings: [B, N, E] float32 -> returns [B, N] float32."""
    B, N, C = embeddings.shape

    # --- hoisted, batch-independent preprocessing (review item 1 & 5) ---
    m = jnp.maximum(params["nodevec1"] @ params["nodevec2"], 0.0)
    adp = jax.nn.softmax(m, axis=1)                                  # [N, N]
    adp_bd = jnp.kron(jnp.eye(B, dtype=adp.dtype), adp.T)            # [B*N, B*N]

    bn_scale = params["bn_g"] * jax.lax.rsqrt(params["bn_v"] + 1e-5)  # [L,1,C]
    bn_shift = params["bn_b"] - params["bn_m"] * bn_scale             # [L,1,C]

    x2d = embeddings.reshape(B * N, C)
    w4_row = params["w4"].reshape(1, -1)                              # [1, C/8]

    inputs = [
        x2d, adp_bd,
        params["skip_w"], params["skip_b"],
        params["gcn_w"], params["gcn_b"],
        bn_scale, bn_shift,
        params["w1"], params["b1"], params["w2"], params["b2"],
        params["w3"], params["b3"], w4_row, params["b4"],
    ]

    def full_spec(a):
        nd = a.ndim
        return pl.BlockSpec(a.shape, lambda i, _nd=nd: (0,) * _nd)

    out = pl.pallas_call(
        _pred_flow_kernel,
        out_shape=jax.ShapeDtypeStruct((1, B * N), jnp.float32),
        grid_spec=pltpu.PrefetchScalarGridSpec(
            num_scalar_prefetch=0,
            grid=(1,),                                  # batch folded into one step
            in_specs=[full_spec(a) for a in inputs],
            out_specs=pl.BlockSpec((1, B * N), lambda i: (0, 0)),
        ),
        compiler_params=pltpu.CompilerParams(
            dimension_semantics=("arbitrary",)),
    )(*inputs)
    return out.reshape(B, N)


# ---------------------------------------------------------------------------
# Pure-JAX reference (mirrors the PyTorch forward, eval mode)
# ---------------------------------------------------------------------------
def reference_forward(embeddings, p):
    x = embeddings                                        # [B, N, C]
    m = jnp.maximum(p["nodevec1"] @ p["nodevec2"], 0.0)
    adp = jax.nn.softmax(m, axis=1)
    skip = jnp.zeros_like(x)
    L = p["skip_w"].shape[0]
    for i in range(L):
        residual = x
        s = jnp.einsum("bnc,cd->bnd", x, p["skip_w"][i]) + p["skip_b"][i]
        skip = skip + s
        x1 = jnp.einsum("vw,bvc->bwc", adp, x)
        x2 = jnp.einsum("vw,bvc->bwc", adp, x1)
        h = jnp.concatenate([x, x1, x2], axis=-1)
        h = jnp.einsum("bnc,cd->bnd", h, p["gcn_w"][i]) + p["gcn_b"][i]
        x = h + residual
        x = (x - p["bn_m"][i]) * jax.lax.rsqrt(p["bn_v"][i] + 1e-5) * p["bn_g"][i] + p["bn_b"][i]
    x = jnp.maximum(skip, 0.0)
    lrelu = lambda v: jnp.where(v > 0, v, 0.01 * v)
    h = lrelu(jnp.einsum("bnc,cd->bnd", x, p["w1"]) + p["b1"])
    h = lrelu(jnp.einsum("bnc,cd->bnd", h, p["w2"]) + p["b2"])
    h = lrelu(jnp.einsum("bnc,cd->bnd", h, p["w3"]) + p["b3"])
    h = jnp.einsum("bnc,cd->bnd", h, p["w4"]) + p["b4"]
    h = jnp.maximum(h, 0.0)
    return h.reshape(x.shape[0], x.shape[1])


# ---------------------------------------------------------------------------
# Parameter construction (deterministic, synthetic)
# ---------------------------------------------------------------------------
def make_params(key, embedding_dim, n_nodes, layers=3, interdim=16):
    C = embedding_dim
    ks = jax.random.split(key, 20)
    f32 = jnp.float32
    p = {
        "nodevec1": jax.random.normal(ks[0], (n_nodes, interdim), f32),
        "nodevec2": jax.random.normal(ks[1], (interdim, n_nodes), f32),
        "skip_w": 0.1 * jax.random.normal(ks[2], (layers, C, C), f32),
        "skip_b": 0.1 * jax.random.normal(ks[3], (layers, 1, C), f32),
        "gcn_w": 0.1 * jax.random.normal(ks[4], (layers, 3 * C, C), f32),
        "gcn_b": 0.1 * jax.random.normal(ks[5], (layers, 1, C), f32),
        "bn_g": 1.0 + 0.1 * jax.random.normal(ks[6], (layers, 1, C), f32),
        "bn_b": 0.1 * jax.random.normal(ks[7], (layers, 1, C), f32),
        "bn_m": jnp.zeros((layers, 1, C), f32),
        "bn_v": jnp.ones((layers, 1, C), f32),
        "w1": 0.1 * jax.random.normal(ks[8], (C, C // 2), f32),
        "b1": 0.1 * jax.random.normal(ks[9], (1, C // 2), f32),
        "w2": 0.1 * jax.random.normal(ks[10], (C // 2, C // 4), f32),
        "b2": 0.1 * jax.random.normal(ks[11], (1, C // 4), f32),
        "w3": 0.1 * jax.random.normal(ks[12], (C // 4, C // 8), f32),
        "b3": 0.1 * jax.random.normal(ks[13], (1, C // 8), f32),
        "w4": 0.1 * jax.random.normal(ks[14], (C // 8, 1), f32),
        "b4": 0.1 * jax.random.normal(ks[15], (1, 1), f32),
    }
    return p


if __name__ == "__main__":
    B, N, E = 2, 16, 32          # batch, n_nodes, embedding_dim
    key = jax.random.PRNGKey(0)
    k_emb, k_par = jax.random.split(key)
    embeddings = jax.random.normal(k_emb, (B, N, E), jnp.float32)   # [B, N, E]
    params = make_params(k_par, embedding_dim=E, n_nodes=N, layers=3, interdim=16)

    out = prediction_layer_flow(embeddings, params)
    out = jax.block_until_ready(out)

    ref = reference_forward(embeddings, params)
    np.testing.assert_allclose(np.asarray(out), np.asarray(ref), rtol=1e-4, atol=1e-4)
    assert out.shape == (B, N)
    print("KERNEL_OK")
</pallas_src>

<mosaic_0001>
module attributes {stable_mosaic.version = 11 : i64} {
  func.func @_pred_flow_kernel(%arg0: i32, %arg1: memref<32x32xf32, #tpu.memory_space<vmem>>, %arg2: memref<32x32xf32, #tpu.memory_space<vmem>>, %arg3: memref<3x32x32xf32, #tpu.memory_space<vmem>>, %arg4: memref<3x1x32xf32, #tpu.memory_space<vmem>>, %arg5: memref<3x96x32xf32, #tpu.memory_space<vmem>>, %arg6: memref<3x1x32xf32, #tpu.memory_space<vmem>>, %arg7: memref<3x1x32xf32, #tpu.memory_space<vmem>>, %arg8: memref<3x1x32xf32, #tpu.memory_space<vmem>>, %arg9: memref<32x16xf32, #tpu.memory_space<vmem>>, %arg10: memref<1x16xf32, #tpu.memory_space<vmem>>, %arg11: memref<16x8xf32, #tpu.memory_space<vmem>>, %arg12: memref<1x8xf32, #tpu.memory_space<vmem>>, %arg13: memref<8x4xf32, #tpu.memory_space<vmem>>, %arg14: memref<1x4xf32, #tpu.memory_space<vmem>>, %arg15: memref<1x4xf32, #tpu.memory_space<vmem>>, %arg16: memref<1x1xf32, #tpu.memory_space<vmem>>, %arg17: memref<1x32xf32, #tpu.memory_space<vmem>>) attributes {dimension_semantics = [#tpu.dimension_semantics<arbitrary>], iteration_bounds = array<i64: 1>, scalar_prefetch = 0 : i64, scratch_operands = 0 : i64, tpu.core_type = #tpu.core_type<tc>, window_params = [{pipeline_mode = #tpu.pipeline_mode<synchronous>, transform_indices = @transform_0, window_bounds = array<i64: 32, 32>}, {pipeline_mode = #tpu.pipeline_mode<synchronous>, transform_indices = @transform_1, window_bounds = array<i64: 32, 32>}, {pipeline_mode = #tpu.pipeline_mode<synchronous>, transform_indices = @transform_2, window_bounds = array<i64: 3, 32, 32>}, {pipeline_mode = #tpu.pipeline_mode<synchronous>, transform_indices = @transform_3, window_bounds = array<i64: 3, 1, 32>}, {pipeline_mode = #tpu.pipeline_mode<synchronous>, transform_indices = @transform_4, window_bounds = array<i64: 3, 96, 32>}, {pipeline_mode = #tpu.pipeline_mode<synchronous>, transform_indices = @transform_5, window_bounds = array<i64: 3, 1, 32>}, {pipeline_mode = #tpu.pipeline_mode<synchronous>, transform_indices = @transform_6, window_bounds = array<i64: 3, 1, 32>}, {pipeline_mode = #tpu.pipeline_mode<synchronous>, transform_indices = @transform_7, window_bounds = array<i64: 3, 1, 32>}, {pipeline_mode = #tpu.pipeline_mode<synchronous>, transform_indices = @transform_8, window_bounds = array<i64: 32, 16>}, {pipeline_mode = #tpu.pipeline_mode<synchronous>, transform_indices = @transform_9, window_bounds = array<i64: 1, 16>}, {pipeline_mode = #tpu.pipeline_mode<synchronous>, transform_indices = @transform_10, window_bounds = array<i64: 16, 8>}, {pipeline_mode = #tpu.pipeline_mode<synchronous>, transform_indices = @transform_11, window_bounds = array<i64: 1, 8>}, {pipeline_mode = #tpu.pipeline_mode<synchronous>, transform_indices = @transform_12, window_bounds = array<i64: 8, 4>}, {pipeline_mode = #tpu.pipeline_mode<synchronous>, transform_indices = @transform_13, window_bounds = array<i64: 1, 4>}, {pipeline_mode = #tpu.pipeline_mode<synchronous>, transform_indices = @transform_14, window_bounds = array<i64: 1, 4>}, {pipeline_mode = #tpu.pipeline_mode<synchronous>, transform_indices = @transform_15, window_bounds = array<i64: 1, 1>}, {pipeline_mode = #tpu.pipeline_mode<synchronous>, transform_indices = @transform_16, window_bounds = array<i64: 1, 32>}]} {
    %c0 = arith.constant 0 : index
    %c0_0 = arith.constant 0 : index
    %0 = vector.load %arg1[%c0, %c0_0] : memref<32x32xf32, #tpu.memory_space<vmem>>, vector<32x32xf32>
    %c0_1 = arith.constant 0 : index
    %c0_2 = arith.constant 0 : index
    %1 = vector.load %arg2[%c0_1, %c0_2] : memref<32x32xf32, #tpu.memory_space<vmem>>, vector<32x32xf32>
    %cst = arith.constant 0.000000e+00 : f32
    %2 = vector.broadcast %cst : f32 to vector<32x32xf32>
    %c0_3 = arith.constant 0 : index
    %c0_4 = arith.constant 0 : index
    %c0_5 = arith.constant 0 : index
    %3 = vector.load %arg3[%c0_3, %c0_4, %c0_5] : memref<3x32x32xf32, #tpu.memory_space<vmem>>, vector<1x32x32xf32>
    %4 = vector.shape_cast %3 : vector<1x32x32xf32> to vector<32x32xf32>
    %cst_6 = arith.constant dense<0.000000e+00> : vector<32x32xf32>
    %5 = tpu.matmul %0, %4, %cst_6 {dimension_numbers = #tpu.dot_dimension_numbers<[1], [0], [0], [1], [0, 0, 1, 1], [], []>} : vector<32x32xf32>, vector<32x32xf32>, vector<32x32xf32> -> vector<32x32xf32>
    %6 = arith.addf %2, %5 : vector<32x32xf32>
    %c0_7 = arith.constant 0 : index
    %c0_8 = arith.constant 0 : index
    %c0_9 = arith.constant 0 : index
    %7 = vector.load %arg4[%c0_7, %c0_8, %c0_9] : memref<3x1x32xf32, #tpu.memory_space<vmem>>, vector<1x1x32xf32>
    %8 = vector.shape_cast %7 : vector<1x1x32xf32> to vector<1x32xf32>
    %9 = vector.broadcast %8 : vector<1x32xf32> to vector<32x32xf32>
    %10 = arith.addf %6, %9 : vector<32x32xf32>
    %cst_10 = arith.constant dense<0.000000e+00> : vector<32x32xf32>
    %11 = tpu.matmul %1, %0, %cst_10 {dimension_numbers = #tpu.dot_dimension_numbers<[1], [0], [0], [1], [0, 0, 1, 1], [], []>} : vector<32x32xf32>, vector<32x32xf32>, vector<32x32xf32> -> vector<32x32xf32>
    %cst_11 = arith.constant dense<0.000000e+00> : vector<32x32xf32>
    %12 = tpu.matmul %1, %11, %cst_11 {dimension_numbers = #tpu.dot_dimension_numbers<[1], [0], [0], [1], [0, 0, 1, 1], [], []>} : vector<32x32xf32>, vector<32x32xf32>, vector<32x32xf32> -> vector<32x32xf32>
    %c0_12 = arith.constant 0 : index
    %c0_13 = arith.constant 0 : index
    %c0_14 = arith.constant 0 : index
    %13 = vector.load %arg5[%c0_12, %c0_13, %c0_14] : memref<3x96x32xf32, #tpu.memory_space<vmem>>, vector<1x32x32xf32>
    %14 = vector.shape_cast %13 : vector<1x32x32xf32> to vector<32x32xf32>
    %cst_15 = arith.constant dense<0.000000e+00> : vector<32x32xf32>
    %15 = tpu.matmul %0, %14, %cst_15 {dimension_numbers = #tpu.dot_dimension_numbers<[1], [0], [0], [1], [0, 0, 1, 1], [], []>} : vector<32x32xf32>, vector<32x32xf32>, vector<32x32xf32> -> vector<32x32xf32>
    %c0_16 = arith.constant 0 : index
    %c32 = arith.constant 32 : index
    %c0_17 = arith.constant 0 : index
    %16 = vector.load %arg5[%c0_16, %c32, %c0_17] : memref<3x96x32xf32, #tpu.memory_space<vmem>>, vector<1x32x32xf32>
    %17 = vector.shape_cast %16 : vector<1x32x32xf32> to vector<32x32xf32>
    %cst_18 = arith.constant dense<0.000000e+00> : vector<32x32xf32>
    %18 = tpu.matmul %11, %17, %cst_18 {dimension_numbers = #tpu.dot_dimension_numbers<[1], [0], [0], [1], [0, 0, 1, 1], [], []>} : vector<32x32xf32>, vector<32x32xf32>, vector<32x32xf32> -> vector<32x32xf32>
    %19 = arith.addf %15, %18 : vector<32x32xf32>
    %c0_19 = arith.constant 0 : index
    %c64 = arith.constant 64 : index
    %c0_20 = arith.constant 0 : index
    %20 = vector.load %arg5[%c0_19, %c64, %c0_20] : memref<3x96x32xf32, #tpu.memory_space<vmem>>, vector<1x32x32xf32>
    %21 = vector.shape_cast %20 : vector<1x32x32xf32> to vector<32x32xf32>
    %cst_21 = arith.constant dense<0.000000e+00> : vector<32x32xf32>
    %22 = tpu.matmul %12, %21, %cst_21 {dimension_numbers = #tpu.dot_dimension_numbers<[1], [0], [0], [1], [0, 0, 1, 1], [], []>} : vector<32x32xf32>, vector<32x32xf32>, vector<32x32xf32> -> vector<32x32xf32>
    %23 = arith.addf %19, %22 : vector<32x32xf32>
    %c0_22 = arith.constant 0 : index
    %c0_23 = arith.constant 0 : index
    %c0_24 = arith.constant 0 : index
    %24 = vector.load %arg6[%c0_22, %c0_23, %c0_24] : memref<3x1x32xf32, #tpu.memory_space<vmem>>, vector<1x1x32xf32>
    %25 = vector.shape_cast %24 : vector<1x1x32xf32> to vector<1x32xf32>
    %26 = vector.broadcast %25 : vector<1x32xf32> to vector<32x32xf32>
    %27 = arith.addf %23, %26 : vector<32x32xf32>
    %28 = arith.addf %27, %0 : vector<32x32xf32>
    %c0_25 = arith.constant 0 : index
    %c0_26 = arith.constant 0 : index
    %c0_27 = arith.constant 0 : index
    %29 = vector.load %arg7[%c0_25, %c0_26, %c0_27] : memref<3x1x32xf32, #tpu.memory_space<vmem>>, vector<1x1x32xf32>
    %30 = vector.shape_cast %29 : vector<1x1x32xf32> to vector<1x32xf32>
    %31 = vector.broadcast %30 : vector<1x32xf32> to vector<32x32xf32>
    %32 = arith.mulf %28, %31 : vector<32x32xf32>
    %c0_28 = arith.constant 0 : index
    %c0_29 = arith.constant 0 : index
    %c0_30 = arith.constant 0 : index
    %33 = vector.load %arg8[%c0_28, %c0_29, %c0_30] : memref<3x1x32xf32, #tpu.memory_space<vmem>>, vector<1x1x32xf32>
    %34 = vector.shape_cast %33 : vector<1x1x32xf32> to vector<1x32xf32>
    %35 = vector.broadcast %34 : vector<1x32xf32> to vector<32x32xf32>
    %36 = arith.addf %32, %35 : vector<32x32xf32>
    %c1 = arith.constant 1 : index
    %c0_31 = arith.constant 0 : index
    %c0_32 = arith.constant 0 : index
    %37 = vector.load %arg3[%c1, %c0_31, %c0_32] : memref<3x32x32xf32, #tpu.memory_space<vmem>>, vector<1x32x32xf32>
    %38 = vector.shape_cast %37 : vector<1x32x32xf32> to vector<32x32xf32>
    %cst_33 = arith.constant dense<0.000000e+00> : vector<32x32xf32>
    %39 = tpu.matmul %36, %38, %cst_33 {dimension_numbers = #tpu.dot_dimension_numbers<[1], [0], [0], [1], [0, 0, 1, 1], [], []>} : vector<32x32xf32>, vector<32x32xf32>, vector<32x32xf32> -> vector<32x32xf32>
    %40 = arith.addf %10, %39 : vector<32x32xf32>
    %c1_34 = arith.constant 1 : index
    %c0_35 = arith.constant 0 : index
    %c0_36 = arith.constant 0 : index
    %41 = vector.load %arg4[%c1_34, %c0_35, %c0_36] : memref<3x1x32xf32, #tpu.memory_space<vmem>>, vector<1x1x32xf32>
    %42 = vector.shape_cast %41 : vector<1x1x32xf32> to vector<1x32xf32>
    %43 = vector.broadcast %42 : vector<1x32xf32> to vector<32x32xf32>
    %44 = arith.addf %40, %43 : vector<32x32xf32>
    %cst_37 = arith.constant dense<0.000000e+00> : vector<32x32xf32>
    %45 = tpu.matmul %1, %36, %cst_37 {dimension_numbers = #tpu.dot_dimension_numbers<[1], [0], [0], [1], [0, 0, 1, 1], [], []>} : vector<32x32xf32>, vector<32x32xf32>, vector<32x32xf32> -> vector<32x32xf32>
    %cst_38 = arith.constant dense<0.000000e+00> : vector<32x32xf32>
    %46 = tpu.matmul %1, %45, %cst_38 {dimension_numbers = #tpu.dot_dimension_numbers<[1], [0], [0], [1], [0, 0, 1, 1], [], []>} : vector<32x32xf32>, vector<32x32xf32>, vector<32x32xf32> -> vector<32x32xf32>
    %c1_39 = arith.constant 1 : index
    %c0_40 = arith.constant 0 : index
    %c0_41 = arith.constant 0 : index
    %47 = vector.load %arg5[%c1_39, %c0_40, %c0_41] : memref<3x96x32xf32, #tpu.memory_space<vmem>>, vector<1x32x32xf32>
    %48 = vector.shape_cast %47 : vector<1x32x32xf32> to vector<32x32xf32>
    %cst_42 = arith.constant dense<0.000000e+00> : vector<32x32xf32>
    %49 = tpu.matmul %36, %48, %cst_42 {dimension_numbers = #tpu.dot_dimension_numbers<[1], [0], [0], [1], [0, 0, 1, 1], [], []>} : vector<32x32xf32>, vector<32x32xf32>, vector<32x32xf32> -> vector<32x32xf32>
    %c1_43 = arith.constant 1 : index
    %c32_44 = arith.constant 32 : index
    %c0_45 = arith.constant 0 : index
    %50 = vector.load %arg5[%c1_43, %c32_44, %c0_45] : memref<3x96x32xf32, #tpu.memory_space<vmem>>, vector<1x32x32xf32>
    %51 = vector.shape_cast %50 : vector<1x32x32xf32> to vector<32x32xf32>
    %cst_46 = arith.constant dense<0.000000e+00> : vector<32x32xf32>
    %52 = tpu.matmul %45, %51, %cst_46 {dimension_numbers = #tpu.dot_dimension_numbers<[1], [0], [0], [1], [0, 0, 1, 1], [], []>} : vector<32x32xf32>, vector<32x32xf32>, vector<32x32xf32> -> vector<32x32xf32>
    %53 = arith.addf %49, %52 : vector<32x32xf32>
    %c1_47 = arith.constant 1 : index
    %c64_48 = arith.constant 64 : index
    %c0_49 = arith.constant 0 : index
    %54 = vector.load %arg5[%c1_47, %c64_48, %c0_49] : memref<3x96x32xf32, #tpu.memory_space<vmem>>, vector<1x32x32xf32>
    %55 = vector.shape_cast %54 : vector<1x32x32xf32> to vector<32x32xf32>
    %cst_50 = arith.constant dense<0.000000e+00> : vector<32x32xf32>
    %56 = tpu.matmul %46, %55, %cst_50 {dimension_numbers = #tpu.dot_dimension_numbers<[1], [0], [0], [1], [0, 0, 1, 1], [], []>} : vector<32x32xf32>, vector<32x32xf32>, vector<32x32xf32> -> vector<32x32xf32>
    %57 = arith.addf %53, %56 : vector<32x32xf32>
    %c1_51 = arith.constant 1 : index
    %c0_52 = arith.constant 0 : index
    %c0_53 = arith.constant 0 : index
    %58 = vector.load %arg6[%c1_51, %c0_52, %c0_53] : memref<3x1x32xf32, #tpu.memory_space<vmem>>, vector<1x1x32xf32>
    %59 = vector.shape_cast %58 : vector<1x1x32xf32> to vector<1x32xf32>
    %60 = vector.broadcast %59 : vector<1x32xf32> to vector<32x32xf32>
    %61 = arith.addf %57, %60 : vector<32x32xf32>
    %62 = arith.addf %61, %36 : vector<32x32xf32>
    %c1_54 = arith.constant 1 : index
    %c0_55 = arith.constant 0 : index
    %c0_56 = arith.constant 0 : index
    %63 = vector.load %arg7[%c1_54, %c0_55, %c0_56] : memref<3x1x32xf32, #tpu.memory_space<vmem>>, vector<1x1x32xf32>
    %64 = vector.shape_cast %63 : vector<1x1x32xf32> to vector<1x32xf32>
    %65 = vector.broadcast %64 : vector<1x32xf32> to vector<32x32xf32>
    %66 = arith.mulf %62, %65 : vector<32x32xf32>
    %c1_57 = arith.constant 1 : index
    %c0_58 = arith.constant 0 : index
    %c0_59 = arith.constant 0 : index
    %67 = vector.load %arg8[%c1_57, %c0_58, %c0_59] : memref<3x1x32xf32, #tpu.memory_space<vmem>>, vector<1x1x32xf32>
    %68 = vector.shape_cast %67 : vector<1x1x32xf32> to vector<1x32xf32>
    %69 = vector.broadcast %68 : vector<1x32xf32> to vector<32x32xf32>
    %70 = arith.addf %66, %69 : vector<32x32xf32>
    %c2 = arith.constant 2 : index
    %c0_60 = arith.constant 0 : index
    %c0_61 = arith.constant 0 : index
    %71 = vector.load %arg3[%c2, %c0_60, %c0_61] : memref<3x32x32xf32, #tpu.memory_space<vmem>>, vector<1x32x32xf32>
    %72 = vector.shape_cast %71 : vector<1x32x32xf32> to vector<32x32xf32>
    %cst_62 = arith.constant dense<0.000000e+00> : vector<32x32xf32>
    %73 = tpu.matmul %70, %72, %cst_62 {dimension_numbers = #tpu.dot_dimension_numbers<[1], [0], [0], [1], [0, 0, 1, 1], [], []>} : vector<32x32xf32>, vector<32x32xf32>, vector<32x32xf32> -> vector<32x32xf32>
    %74 = arith.addf %44, %73 : vector<32x32xf32>
    %c2_63 = arith.constant 2 : index
    %c0_64 = arith.constant 0 : index
    %c0_65 = arith.constant 0 : index
    %75 = vector.load %arg4[%c2_63, %c0_64, %c0_65] : memref<3x1x32xf32, #tpu.memory_space<vmem>>, vector<1x1x32xf32>
    %76 = vector.shape_cast %75 : vector<1x1x32xf32> to vector<1x32xf32>
    %77 = vector.broadcast %76 : vector<1x32xf32> to vector<32x32xf32>
    %78 = arith.addf %74, %77 : vector<32x32xf32>
    %cst_66 = arith.constant 0.000000e+00 : f32
    %79 = vector.broadcast %cst_66 : f32 to vector<32x32xf32>
    %80 = arith.maximumf %78, %79 : vector<32x32xf32>
    %c0_67 = arith.constant 0 : index
    %c0_68 = arith.constant 0 : index
    %81 = vector.load %arg9[%c0_67, %c0_68] : memref<32x16xf32, #tpu.memory_space<vmem>>, vector<32x16xf32>
    %cst_69 = arith.constant dense<0.000000e+00> : vector<32x16xf32>
    %82 = tpu.matmul %80, %81, %cst_69 {dimension_numbers = #tpu.dot_dimension_numbers<[1], [0], [0], [1], [0, 0, 1, 1], [], []>} : vector<32x32xf32>, vector<32x16xf32>, vector<32x16xf32> -> vector<32x16xf32>
    %c0_70 = arith.constant 0 : index
    %c0_71 = arith.constant 0 : index
    %83 = vector.load %arg10[%c0_70, %c0_71] : memref<1x16xf32, #tpu.memory_space<vmem>>, vector<1x16xf32>
    %84 = vector.broadcast %83 : vector<1x16xf32> to vector<32x16xf32>
    %85 = arith.addf %82, %84 : vector<32x16xf32>
    %cst_72 = arith.constant 0.000000e+00 : f32
    %86 = vector.broadcast %cst_72 : f32 to vector<32x16xf32>
    %87 = arith.cmpf ogt, %85, %86 : vector<32x16xf32>
    %cst_73 = arith.constant 0.00999999977 : f32
    %88 = vector.broadcast %cst_73 : f32 to vector<32x16xf32>
    %89 = arith.mulf %88, %85 : vector<32x16xf32>
    %90 = arith.select %87, %85, %89 : vector<32x16xi1>, vector<32x16xf32>
    %c0_74 = arith.constant 0 : index
    %c0_75 = arith.constant 0 : index
    %91 = vector.load %arg11[%c0_74, %c0_75] : memref<16x8xf32, #tpu.memory_space<vmem>>, vector<16x8xf32>
    %cst_76 = arith.constant dense<0.000000e+00> : vector<32x8xf32>
    %92 = tpu.matmul %90, %91, %cst_76 {dimension_numbers = #tpu.dot_dimension_numbers<[1], [0], [0], [1], [0, 0, 1, 1], [], []>} : vector<32x16xf32>, vector<16x8xf32>, vector<32x8xf32> -> vector<32x8xf32>
    %c0_77 = arith.constant 0 : index
    %c0_78 = arith.constant 0 : index
    %93 = vector.load %arg12[%c0_77, %c0_78] : memref<1x8xf32, #tpu.memory_space<vmem>>, vector<1x8xf32>
    %94 = vector.broadcast %93 : vector<1x8xf32> to vector<32x8xf32>
    %95 = arith.addf %92, %94 : vector<32x8xf32>
    %cst_79 = arith.constant 0.000000e+00 : f32
    %96 = vector.broadcast %cst_79 : f32 to vector<32x8xf32>
    %97 = arith.cmpf ogt, %95, %96 : vector<32x8xf32>
    %cst_80 = arith.constant 0.00999999977 : f32
    %98 = vector.broadcast %cst_80 : f32 to vector<32x8xf32>
    %99 = arith.mulf %98, %95 : vector<32x8xf32>
    %100 = arith.select %97, %95, %99 : vector<32x8xi1>, vector<32x8xf32>
    %c0_81 = arith.constant 0 : index
    %c0_82 = arith.constant 0 : index
    %101 = vector.load %arg13[%c0_81, %c0_82] : memref<8x4xf32, #tpu.memory_space<vmem>>, vector<8x4xf32>
    %cst_83 = arith.constant dense<0.000000e+00> : vector<32x4xf32>
    %102 = tpu.matmul %100, %101, %cst_83 {dimension_numbers = #tpu.dot_dimension_numbers<[1], [0], [0], [1], [0, 0, 1, 1], [], []>} : vector<32x8xf32>, vector<8x4xf32>, vector<32x4xf32> -> vector<32x4xf32>
    %c0_84 = arith.constant 0 : index
    %c0_85 = arith.constant 0 : index
    %103 = vector.load %arg14[%c0_84, %c0_85] : memref<1x4xf32, #tpu.memory_space<vmem>>, vector<1x4xf32>
    %104 = vector.broadcast %103 : vector<1x4xf32> to vector<32x4xf32>
    %105 = arith.addf %102, %104 : vector<32x4xf32>
    %cst_86 = arith.constant 0.000000e+00 : f32
    %106 = vector.broadcast %cst_86 : f32 to vector<32x4xf32>
    %107 = arith.cmpf ogt, %105, %106 : vector<32x4xf32>
    %cst_87 = arith.constant 0.00999999977 : f32
    %108 = vector.broadcast %cst_87 : f32 to vector<32x4xf32>
    %109 = arith.mulf %108, %105 : vector<32x4xf32>
    %110 = arith.select %107, %105, %109 : vector<32x4xi1>, vector<32x4xf32>
    %c0_88 = arith.constant 0 : index
    %c0_89 = arith.constant 0 : index
    %111 = vector.load %arg15[%c0_88, %c0_89] : memref<1x4xf32, #tpu.memory_space<vmem>>, vector<1x4xf32>
    %112 = vector.broadcast %111 : vector<1x4xf32> to vector<32x4xf32>
    %113 = arith.mulf %110, %112 : vector<32x4xf32>
    %cst_90 = arith.constant dense<0.000000e+00> : vector<32xf32>
    %114 = vector.multi_reduction <add>, %113, %cst_90 [1] : vector<32x4xf32> to vector<32xf32>
    %115 = vector.shape_cast %114 : vector<32xf32> to vector<1x32xf32>
    %c0_91 = arith.constant 0 : index
    %c0_92 = arith.constant 0 : index
    %116 = vector.load %arg16[%c0_91, %c0_92] : memref<1x1xf32, #tpu.memory_space<vmem>>, vector<1x1xf32>
    %117 = vector.broadcast %116 : vector<1x1xf32> to vector<1x32xf32>
    %118 = arith.addf %115, %117 : vector<1x32xf32>
    %cst_93 = arith.constant 0.000000e+00 : f32
    %119 = vector.broadcast %cst_93 : f32 to vector<1x32xf32>
    %120 = arith.maximumf %118, %119 : vector<1x32xf32>
    %c0_94 = arith.constant 0 : index
    %c0_95 = arith.constant 0 : index
    %121 = vector.load %arg17[%c0_94, %c0_95] : memref<1x32xf32, #tpu.memory_space<vmem>>, vector<1x32xf32>
    tpu.vector_store %arg17[%c0_94, %c0_95], %120 {strides = array<i32>} : memref<1x32xf32, #tpu.memory_space<vmem>>, vector<1x32xf32>,
    return
  }
  func.func @transform_0(%arg0: i32) -> (i32, i32) {
    %c0_i32 = arith.constant 0 : i32
    %c0_i32_0 = arith.constant 0 : i32
    %c0_i32_1 = arith.constant 0 : i32
    return %c0_i32, %c0_i32_0 : i32, i32
  }
  func.func @transform_1(%arg0: i32) -> (i32, i32) {
    %c0_i32 = arith.constant 0 : i32
    %c0_i32_0 = arith.constant 0 : i32
    %c0_i32_1 = arith.constant 0 : i32
    return %c0_i32, %c0_i32_0 : i32, i32
  }
  func.func @transform_2(%arg0: i32) -> (i32, i32, i32) {
    %c0_i32 = arith.constant 0 : i32
    %c0_i32_0 = arith.constant 0 : i32
    %c0_i32_1 = arith.constant 0 : i32
    %c0_i32_2 = arith.constant 0 : i32
    return %c0_i32, %c0_i32_0, %c0_i32_1 : i32, i32, i32
  }
  func.func @transform_3(%arg0: i32) -> (i32, i32, i32) {
    %c0_i32 = arith.constant 0 : i32
    %c0_i32_0 = arith.constant 0 : i32
    %c0_i32_1 = arith.constant 0 : i32
    %c0_i32_2 = arith.constant 0 : i32
    return %c0_i32, %c0_i32_0, %c0_i32_1 : i32, i32, i32
  }
  func.func @transform_4(%arg0: i32) -> (i32, i32, i32) {
    %c0_i32 = arith.constant 0 : i32
    %c0_i32_0 = arith.constant 0 : i32
    %c0_i32_1 = arith.constant 0 : i32
    %c0_i32_2 = arith.constant 0 : i32
    return %c0_i32, %c0_i32_0, %c0_i32_1 : i32, i32, i32
  }
  func.func @transform_5(%arg0: i32) -> (i32, i32, i32) {
    %c0_i32 = arith.constant 0 : i32
    %c0_i32_0 = arith.constant 0 : i32
    %c0_i32_1 = arith.constant 0 : i32
    %c0_i32_2 = arith.constant 0 : i32
    return %c0_i32, %c0_i32_0, %c0_i32_1 : i32, i32, i32
  }
  func.func @transform_6(%arg0: i32) -> (i32, i32, i32) {
    %c0_i32 = arith.constant 0 : i32
    %c0_i32_0 = arith.constant 0 : i32
    %c0_i32_1 = arith.constant 0 : i32
    %c0_i32_2 = arith.constant 0 : i32
    return %c0_i32, %c0_i32_0, %c0_i32_1 : i32, i32, i32
  }
  func.func @transform_7(%arg0: i32) -> (i32, i32, i32) {
    %c0_i32 = arith.constant 0 : i32
    %c0_i32_0 = arith.constant 0 : i32
    %c0_i32_1 = arith.constant 0 : i32
    %c0_i32_2 = arith.constant 0 : i32
    return %c0_i32, %c0_i32_0, %c0_i32_1 : i32, i32, i32
  }
  func.func @transform_8(%arg0: i32) -> (i32, i32) {
    %c0_i32 = arith.constant 0 : i32
    %c0_i32_0 = arith.constant 0 : i32
    %c0_i32_1 = arith.constant 0 : i32
    return %c0_i32, %c0_i32_0 : i32, i32
  }
  func.func @transform_9(%arg0: i32) -> (i32, i32) {
    %c0_i32 = arith.constant 0 : i32
    %c0_i32_0 = arith.constant 0 : i32
    %c0_i32_1 = arith.constant 0 : i32
    return %c0_i32, %c0_i32_0 : i32, i32
  }
  func.func @transform_10(%arg0: i32) -> (i32, i32) {
    %c0_i32 = arith.constant 0 : i32
    %c0_i32_0 = arith.constant 0 : i32
    %c0_i32_1 = arith.constant 0 : i32
    return %c0_i32, %c0_i32_0 : i32, i32
  }
  func.func @transform_11(%arg0: i32) -> (i32, i32) {
    %c0_i32 = arith.constant 0 : i32
    %c0_i32_0 = arith.constant 0 : i32
    %c0_i32_1 = arith.constant 0 : i32
    return %c0_i32, %c0_i32_0 : i32, i32
  }
  func.func @transform_12(%arg0: i32) -> (i32, i32) {
    %c0_i32 = arith.constant 0 : i32
    %c0_i32_0 = arith.constant 0 : i32
    %c0_i32_1 = arith.constant 0 : i32
    return %c0_i32, %c0_i32_0 : i32, i32
  }
  func.func @transform_13(%arg0: i32) -> (i32, i32) {
    %c0_i32 = arith.constant 0 : i32
    %c0_i32_0 = arith.constant 0 : i32
    %c0_i32_1 = arith.constant 0 : i32
    return %c0_i32, %c0_i32_0 : i32, i32
  }
  func.func @transform_14(%arg0: i32) -> (i32, i32) {
    %c0_i32 = arith.constant 0 : i32
    %c0_i32_0 = arith.constant 0 : i32
    %c0_i32_1 = arith.constant 0 : i32
    return %c0_i32, %c0_i32_0 : i32, i32
  }
  func.func @transform_15(%arg0: i32) -> (i32, i32) {
    %c0_i32 = arith.constant 0 : i32
    %c0_i32_0 = arith.constant 0 : i32
    %c0_i32_1 = arith.constant 0 : i32
    return %c0_i32, %c0_i32_0 : i32, i32
  }
  func.func @transform_16(%arg0: i32) -> (i32, i32) {
    %c0_i32 = arith.constant 0 : i32
    %c0_i32_0 = arith.constant 0 : i32
    %c0_i32_1 = arith.constant 0 : i32
    return %c0_i32, %c0_i32_0 : i32, i32
  }
}

</mosaic_0001>

<bundles_post_ra>
// kernel: tpu_custom_call.1
= control target key start
LH: loop header
LB: loop body
LE: loop exit
PB: predicated region body
PF: predicated region fallthrough
CT: control target
= control target key end

     0   :  { %s2920_s0 = inlined_call_operand.vmem [shape: f32[32,32], index: 0, kind: input, shape index: {}]   ;;  %s2921_s1 = inlined_call_operand.vmem [shape: f32[32,32], index: 1, kind: input, shape index: {}]   ;;  %s2922_s2 = inlined_call_operand.vmem [shape: f32[3,32,32], index: 2, kind: input, shape index: {}]   ;;  %s2923_s3 = inlined_call_operand.vmem [shape: f32[3,1,32], index: 3, kind: input, shape index: {}]   ;;  %s2924_s4 = inlined_call_operand.vmem [shape: f32[3,96,32], index: 4, kind: input, shape index: {}]   ;;  %s2925_s5 = inlined_call_operand.vmem [shape: f32[3,1,32], index: 5, kind: input, shape index: {}]   ;;  %s2926_s6 = inlined_call_operand.vmem [shape: f32[3,1,32], index: 6, kind: input, shape index: {}]   ;;  %s2927_s7 = inlined_call_operand.vmem [shape: f32[3,1,32], index: 7, kind: input, shape index: {}]   ;;  %s2928_s8 = inlined_call_operand.vmem [shape: f32[32,16], index: 8, kind: input, shape index: {}]   ;;  %s2929_s9 = inlined_call_operand.vmem [shape: f32[1,16], index: 9, kind: input, shape index: {}]   ;;  %s2930_s10 = inlined_call_operand.vmem [shape: f32[16,8], index: 10, kind: input, shape index: {}]   ;;  %s2931_s11 = inlined_call_operand.vmem [shape: f32[1,8], index: 11, kind: input, shape index: {}]   ;;  %s2932_s12 = inlined_call_operand.vmem [shape: f32[8,4], index: 12, kind: input, shape index: {}]   ;;  %s2933_s13 = inlined_call_operand.vmem [shape: f32[1,4], index: 13, kind: input, shape index: {}]   ;;  %s2934_s14 = inlined_call_operand.vmem [shape: f32[1,4], index: 14, kind: input, shape index: {}]   ;;  %s2935_s15 = inlined_call_operand.<no memory space> [shape: f32[1,1], index: 15, kind: input, shape index: {}]   ;;  %s2936_s16 = inlined_call_operand.hbm [shape: f32[1,32], index: 16, kind: output, shape index: {}]  }
   0x1   :  { %2938 = sst [smem:[#allocation6_spill]] %s2920_s0  ;;  %v21_v0 = vstv %s2935_s15 }
   0x2   :  { %22 = vst [vmem:[#allocation2] sm:$0x1] %v21_v0 }
   0x3   :  { %s2939_s25 = sld [smem:[#allocation6_spill]]  ;;  %vm75_vm0 = vcmask 261120   ;;  %v2609_v6 = vld [vmem:[%s2921_s1] sm:$0xff]  ;;  %v360_v9 = vld [vmem:[%s2924_s4 + $0x28] sm:$0xff]  ;;  %v66_v13 = vld [vmem:[%s2922_s2 + $0x10] sm:$0xff] }
   0x4   :  { %2127 = vmatprep.mubr.msk.f32.mxu1 %vm75_vm0, %v2609_v6  ;;  %v359_v8 = vld [vmem:[%s2924_s4 + $0x20] sm:$0xff]  ;;  %v65_v11 = vld [vmem:[%s2922_s2 + $0x8] sm:$0xff]  ;;  %v67_v15 = vld [vmem:[%s2922_s2 + $0x18] sm:$0xff] }
   0x5   :  { %v64_v10 = vld [vmem:[%s2922_s2] sm:$0xff]  ;;  %v2343_v14 = vpack.c.bf16 %v360_v9, %v359_v8 }
   0x6   :  { %v2319_v12 = vpack.c.bf16 %v65_v11, %v64_v10 }
   0x9   :  { %v2587_v1 = vld [vmem:[%s2939_s25] sm:$0xff]  ;;  %v2592_v2 = vld [vmem:[%s2939_s25 + $0x8] sm:$0xff]  ;;  %v2597_v3 = vld [vmem:[%s2939_s25 + $0x10] sm:$0xff] }
   0xa   :  { %v2327_v4 = vpack.c.bf16 %v2592_v2, %v2587_v1  ;;  %v2604_v5 = vld [vmem:[%s2939_s25 + $0x18] sm:$0xff]  ;;  %2113 = vmatprep.mubr.msk.f32.mxu0 %vm75_vm0, %v2587_v1 }
   0xb   :  { %v2331_v7 = vpack.c.bf16 %v2604_v5, %v2597_v3 }
   0xc   :  { %2328 = vmatprep.subr.bf16.mxu1 %v2327_v4 }
   0xd   :  { %2330 = vmatpush3.bf16.msra.mxu1 %v2327_v4 }
   0xe   :  { %2332 = vmatprep.subr.bf16.mxu1 %v2331_v7 }
   0xf   :  { %23 = vsyncpa [#allocation4], 0  ;;  %2320 = vmatprep.subr.bf16.mxu0 %v2319_v12  ;;  %v361_v16 = vld [vmem:[%s2924_s4 + $0x30] sm:$0xff]  ;;  %v362_v17 = vld [vmem:[%s2924_s4 + $0x38] sm:$0xff]  ;;  %v2323_v18 = vpack.c.bf16 %v67_v15, %v66_v13  ;;  %vm1562_vm3 = vcmask 130048   ;;  %vm1680_vm8 = vcmask 64512  }
  0x10   :  { %2322 = vmatpush3.bf16.msra.mxu0 %v2319_v12  ;;  %v2644_v19 = vld [vmem:[%s2921_s1 + $0x8] sm:$0xff]  ;;  %v2649_v20 = vld [vmem:[%s2921_s1 + $0x10] sm:$0xff]  ;;  %v2347_v21 = vpack.c.bf16 %v362_v17, %v361_v16  ;;  %v2658_v22 = vld [vmem:[%s2921_s1 + $0x18] sm:$0xff]  ;;  %vm1801_vm13 = vcmask 31744  }
  0x11   :  { %2334 = vmatpush3.bf16.msra.mxu1 %v2331_v7  ;;  %2324 = vmatprep.subr.bf16.mxu0 %v2323_v18  ;;  %v355_v23 = vld [vmem:[%s2924_s4] sm:$0xff]  ;;  %v356_v24 = vld [vmem:[%s2924_s4 + $0x8] sm:$0xff]  ;;  %v357_v26 = vld [vmem:[%s2924_s4 + $0x10] sm:$0xff] }
  0x12   :  { %2344 = vmatprep.subr.bf16.mxu1 %v2343_v14  ;;  %v2351_v25 = vpack.c.bf16 %v356_v24, %v355_v23  ;;  %v358_v27 = vld [vmem:[%s2924_s4 + $0x18] sm:$0xff]  ;;  %v545_v32 = vld [vmem:[%s2924_s4 + $0x40] sm:$0xff]  ;;  %v546_v33 = vld [vmem:[%s2924_s4 + $0x48] sm:$0xff] }
  0x13   :  { %v2355_v30 = vpack.c.bf16 %v358_v27, %v357_v26  ;;  %v2359_v37 = vpack.c.bf16 %v546_v33, %v545_v32  ;;  %v547_v38 = vld [vmem:[%s2924_s4 + $0x50] sm:$0xff]  ;;  %v548_v39 = vld [vmem:[%s2924_s4 + $0x58] sm:$0xff]  ;;  %v1908_v45 = vld [vmem:[%s2922_s2 + $0x20] sm:$0xff] }
  0x14   :  { %2128 = vmatmul.mubr.msk.f32.vlgmr.msra.gmra.mrb[0].mxu1 %vm75_vm0, %v2644_v19  ;;  %2326 = vmatpush3.bf16.msra.mxu0 %v2323_v18  ;;  %v2363_v40 = vpack.c.bf16 %v548_v39, %v547_v38  ;;  %v1909_v46 = vld [vmem:[%s2922_s2 + $0x28] sm:$0xff]  ;;  %v1910_v48 = vld [vmem:[%s2922_s2 + $0x30] sm:$0xff]  ;;  %v1911_v49 = vld [vmem:[%s2922_s2 + $0x38] sm:$0xff] }
  0x15   :  { %2130 = vmatprep.mubr.msk.f32.mxu1 %vm75_vm0, %v2649_v20  ;;  %2346 = vmatpush3.bf16.msra.mxu1 %v2343_v14  ;;  %v2367_v47 = vpack.c.bf16 %v1909_v46, %v1908_v45  ;;  %v2371_v50 = vpack.c.bf16 %v1911_v49, %v1910_v48  ;;  %v1930_v51 = vld [vmem:[%s2924_s4 + $0x80] sm:$0xff]  ;;  %v1931_v52 = vld [vmem:[%s2924_s4 + $0x88] sm:$0xff]  ;;  %v1932_v53 = vld [vmem:[%s2924_s4 + $0x90] sm:$0xff] }
  0x16   :  { %2348 = vmatprep.subr.bf16.mxu1 %v2347_v21  ;;  %v2391_v54 = vpack.c.bf16 %v1931_v52, %v1930_v51  ;;  %v1933_v55 = vld [vmem:[%s2924_s4 + $0x98] sm:$0xff]  ;;  %v1905_v57 = vld [vmem:[%s2925_s5] ss:$0 sm:$0xff]  ;;  %v1927_v23 = vld [vmem:[%s2924_s4 + $0x68] sm:$0xff] }
  0x17   :  { %2114 = vmatmul.mubr.msk.f32.vlgmr.msra.gmra.mrb[0].mxu0 %vm75_vm0, %v2592_v2  ;;  %v2395_v56 = vpack.c.bf16 %v1933_v55, %v1932_v53  ;;  %v1906_v61 = vld [vmem:[%s2926_s6] ss:$0 sm:$0xff]  ;;  %v1929_v26 = vld [vmem:[%s2924_s4 + $0x78] sm:$0xff]  ;;  %v1951_v46 = vld [vmem:[%s2925_s5 + $0x1] ss:$0 sm:$0xff] }
  0x18   :  { %2131 = vmatmul.mubr.msk.f32.gmra.mrb[2].mxu1 %vm75_vm0, %v2658_v22  ;;  %2116 = vmatprep.mubr.msk.f32.mxu0 %vm75_vm0, %v2597_v3  ;;  %v1907_v0 = vld [vmem:[%s2927_s7] ss:$0 sm:$0xff] }
  0x19   :  { %2350 = vmatpush3.bf16.msra.mxu1 %v2347_v21 }
  0x1a   :  { %2352 = vmatprep.subr.bf16.mxu1 %v2351_v25 }
  0x1b   :  { %2117 = vmatmul.mubr.msk.f32.gmra.mrb[2].mxu0 %vm75_vm0, %v2604_v5 }
  0x1c   :  { %2141 = vmatprep.mubr.msk.f32.mxu0 %vm75_vm0, %v2609_v6 }
  0xe7   :  { %v2129_v28 = vpop.f32.mrb[0].mxu1 }
  0xe8   :  { %v251_v29 = vpop.f32.mrb[1].mxu1 }
  0xe9   :  { %v2335_v31 = vpack.c.bf16 %v2129_v28, %v251_v29  ;;  %2155 = vmatprep.mubr.msk.f32.mxu1 %vm75_vm0, %v251_v29 }
  0xea   :  { %2156 = vmatmul.mubr.msk.f32.vlgmr.msra.gmra.mrb[4].mxu1 %vm75_vm0, %v2129_v28 }
  0xeb   :  { %v2132_v34 = vpop.f32.mrb[2].mxu1  ;;  %2336 = vmatprep.subr.bf16.mxu0 %v2335_v31  ;;  %2354 = vmatpush3.bf16.msra.mxu1 %v2351_v25  ;;  %v1928_v25 = vld [vmem:[%s2924_s4 + $0x70] sm:$0xff] }
  0xec   :  { %v261_v35 = vpop.f32.mrb[3].mxu1  ;;  %2338 = vmatpush3.bf16.msra.mxu0 %v2335_v31  ;;  %2356 = vmatprep.subr.bf16.mxu1 %v2355_v30  ;;  %v2403_v28 = vpack.c.bf16 %v1929_v26, %v1928_v25  ;;  %v1943_v31 = vld [vmem:[%s2924_s4 + $0xa8] sm:$0xff] }
  0xed   :  { %v2339_v36 = vpack.c.bf16 %v2132_v34, %v261_v35  ;;  %2158 = vmatprep.mubr.msk.f32.mxu1 %vm75_vm0, %v261_v35 }
  0xee   :  { %2159 = vmatmul.mubr.msk.f32.gmra.mrb[6].mxu1 %vm75_vm0, %v2132_v34 }
  0xef   :  { %2340 = vmatprep.subr.bf16.mxu0 %v2339_v36  ;;  %2358 = vmatpush3.bf16.msra.mxu1 %v2355_v30  ;;  %v1942_v30 = vld [vmem:[%s2924_s4 + $0xa0] sm:$0xff] }
  0xf0   :  { %2342 = vmatpush3.bf16.msra.mxu0 %v2339_v36  ;;  %2169 = vmatprep.mubr.msk.f32.mxu1 %vm75_vm0, %v2587_v1  ;;  %v2407_v35 = vpack.c.bf16 %v1943_v31, %v1942_v30  ;;  %v1944_v36 = vld [vmem:[%s2924_s4 + $0xb0] sm:$0xff] }
  0xf1   :  { %2360 = vmatprep.subr.bf16.mxu1 %v2359_v37  ;;  %2368 = vmatprep.subr.bf16.mxu0 %v2367_v47 }
  0xf2   :  { %2170 = vmatmul.mubr.msk.f32.vlgmr.msra.gmra.mrb[4].mxu1 %vm75_vm0, %v2592_v2 }
  0xf3   :  { %2142 = vmatmul.mubr.msk.f32.vlgmr.msra.gmra.mrb[4].mxu0 %vm75_vm0, %v2644_v19  ;;  %2362 = vmatpush3.bf16.msra.mxu1 %v2359_v37  ;;  %v1945_v37 = vld [vmem:[%s2924_s4 + $0xb8] sm:$0xff] }
  0xf4   :  { %2144 = vmatprep.mubr.msk.f32.mxu0 %vm75_vm0, %v2649_v20  ;;  %2172 = vmatprep.mubr.msk.f32.mxu1 %vm75_vm0, %v2597_v3  ;;  %v2411_v38 = vpack.c.bf16 %v1945_v37, %v1944_v36  ;;  %v1966_v37 = vld [vmem:[%s2929_s9] ss:$0 sm:$0xff] }
  0xf5   :  { %2364 = vmatprep.subr.bf16.mxu1 %v2363_v40  ;;  %2370 = vmatpush3.bf16.msra.mxu0 %v2367_v47 }
  0xf6   :  { %2173 = vmatmul.mubr.msk.f32.gmra.mrb[6].mxu1 %vm75_vm0, %v2604_v5  ;;  %2372 = vmatprep.subr.bf16.mxu0 %v2371_v50 }
  0xf7   :  { %2145 = vmatmul.mubr.msk.f32.gmra.mrb[6].mxu0 %vm75_vm0, %v2658_v22  ;;  %2366 = vmatpush3.bf16.msra.mxu1 %v2363_v40 }
  0xf8   :  { %2392 = vmatprep.subr.bf16.mxu1 %v2391_v54 }
  0xf9   :  { %2374 = vmatpush3.bf16.msra.mxu0 %v2371_v50  ;;  %v1953_v50 = vld [vmem:[%s2926_s6 + $0x1] ss:$0 sm:$0xff] }
 0x1c6   :  { %v2143_v41 = vpop.f32.mrb[4].mxu0 }
 0x1c7   :  { %v336_v42 = vpop.f32.mrb[5].mxu0 }
 0x1c8   :  { %2183 = vmatprep.mubr.msk.f32.mxu1 %vm75_vm0, %v336_v42 }
 0x1c9   :  { %2184 = vmatmul.mubr.msk.f32.vlgmr.msra.gmra.mrb[4].mxu1 %vm75_vm0, %v2143_v41 }
 0x1ca   :  { %v2146_v43 = vpop.f32.mrb[6].mxu0  ;;  %2394 = vmatpush3.bf16.msra.mxu1 %v2391_v54 }
 0x1cb   :  { %v346_v44 = vpop.f32.mrb[7].mxu0  ;;  %2396 = vmatprep.subr.bf16.mxu1 %v2395_v56 }
 0x1cc   :  { %2186 = vmatprep.mubr.msk.f32.mxu1 %vm75_vm0, %v346_v44  ;;  %v1959_v44 = vld [vmem:[%s2922_s2 + $0x58] sm:$0xff] }
 0x1cd   :  { %2187 = vmatmul.mubr.msk.f32.gmra.mrb[6].mxu1 %vm75_vm0, %v2146_v43  ;;  %v1958_v43 = vld [vmem:[%s2922_s2 + $0x50] sm:$0xff] }
 0x1ce   :  { %2398 = vmatpush3.bf16.msra.mxu1 %v2395_v56  ;;  %v2419_v45 = vpack.c.bf16 %v1959_v44, %v1958_v43  ;;  %v1955_v56 = vld [vmem:[%s2927_s7 + $0x1] ss:$0 sm:$0xff] }
 0x29c   :  { %v2185_v58 = vpop.f32.mrb[4].mxu1 }
 0x29d   :  { %v658_v59 = vadd.f32 %v2185_v58, %v1905_v57  ;;  %v627_v60 = vpop.f32.mrb[5].mxu1 }
 0x29e   :  { %v657_v62 = vadd.f32 %v1905_v57, %v627_v60 }
 0x29f   :  { %v662_v63 = vadd.f32 %v658_v59, %v2592_v2 }
 0x2a0   :  { %v661_v4 = vadd.f32 %v657_v62, %v2587_v1  ;;  %v2188_v7 = vpop.f32.mrb[6].mxu1 }
 0x2a1   :  { %v673_v8 = vmul.f32 %v1906_v61, %v662_v63  ;;  %v660_v9 = vadd.f32 %v2188_v7, %v1905_v57  ;;  %v637_v10 = vpop.f32.mrb[7].mxu1 }
 0x2a2   :  { %v672_v11 = vmul.f32 %v1906_v61, %v661_v4  ;;  %v659_v12 = vadd.f32 %v1905_v57, %v637_v10  ;;  %v1433_v10 = vld [vmem:[%s2928_s8] sm:$0xff] }
 0x2a3   :  { %v2751_v13 = vadd.f32 %v1907_v0, %v673_v8  ;;  %v664_v14 = vadd.f32 %v660_v9, %v2604_v5  ;;  %v1926_v5 = vld [vmem:[%s2924_s4 + $0x60] sm:$0xff] }
 0x2a4   :  { %v2754_v15 = vadd.f32 %v1907_v0, %v672_v11  ;;  %v663_v2 = vadd.f32 %v659_v12, %v2597_v3  ;;  %v2399_v24 = vpack.c.bf16 %v1927_v23, %v1926_v5  ;;  %v1434_v11 = vld [vmem:[%s2928_s8 + $0x8] sm:$0xff] }
 0x2a5   :  { %v675_v16 = vmul.f32 %v1906_v61, %v664_v14  ;;  %v2423_v12 = vpack.c.bf16 %v1434_v11, %v1433_v10  ;;  %v1436_v14 = vld [vmem:[%s2928_s8 + $0x18] sm:$0xff]  ;;  %v2494_v10 = vmov 0   ;;  %v1976_v11 = vld [vmem:[%s2933_s13] ss:$0 sm:$0xff]  ;;  %s2495_s13 = smov [#allocation3]  }
 0x2a6   :  { %v674_v17 = vmul.f32 %v1906_v61, %v663_v2  ;;  %2197 = vmatprep.mubr.msk.f32.mxu0 %vm75_vm0, %v2754_v15  ;;  %v2375_v1 = vpack.c.bf16 %v2751_v13, %v2754_v15  ;;  %2400 = vmatprep.subr.bf16.mxu1 %v2399_v24  ;;  %v1880_v2 = vld [vmem:[%s2923_s3] ss:$0 sm:$0xff] }
 0x2a7   :  { %v2761_v18 = vadd.f32 %v1907_v0, %v675_v16  ;;  %2198 = vmatmul.mubr.msk.f32.vlgmr.msra.gmra.mrb[0].mxu0 %vm75_vm0, %v2751_v13  ;;  %v1917_v16 = vld [vmem:[%s2923_s3 + $0x1] ss:$0 sm:$0xff]  ;;  %2469 = vset.pattern.permute.xlu0 %v2494_v10 }
 0x2a8   :  { %v2765_v21 = vadd.f32 %v1907_v0, %v674_v17  ;;  %2376 = vmatprep.subr.bf16.mxu0 %v2375_v1  ;;  %v2437_v17 = vadd.f32 %v1917_v16, %v1880_v2  ;;  %v1981_v16 = vld [vmem:[%s2934_s14] ss:$0 sm:$0xff]  ;;  %s1872_s14 = sshll.u32 %s2495_s13, 4  ;;  %s1873_s14 = int_to_ptr.vmem [resolvable:$true] %s1872_s14 }
 0x2a9   :  { %2378 = vmatpush3.bf16.msra.mxu0 %v2375_v1  ;;  %s2470_s5 = scalar_lea.vmem %s1873_s14, 16  ;;  %s2474_s6 = scalar_lea.vmem %s1873_s14, 32 }
 0x2aa   :  { %2200 = vmatprep.mubr.msk.f32.mxu0 %vm75_vm0, %v2765_v21  ;;  %v2379_v3 = vpack.c.bf16 %v2761_v18, %v2765_v21  ;;  %p2471_p0 = scmp.ne.s32.totalorder %s1873_s14, %s2470_s5  ;;  %p2475_p1 = scmp.lt.s32.totalorder %s1873_s14, %s1873_s14 }
 0x2ab   :  { %2201 = vmatmul.mubr.msk.f32.gmra.mrb[2].mxu0 %vm75_vm0, %v2761_v18  ;;  %p2476_p2 = scmp.lt.s32.totalorder %s2474_s6, %s2470_s5 }
 0x2ac   :  { %2380 = vmatprep.subr.bf16.mxu0 %v2379_v3  ;;  %2211 = vmatprep.mubr.msk.f32.mxu0 %vm75_vm0, %v2609_v6 }
 0x2ad   :  { %2382 = vmatpush3.bf16.msra.mxu0 %v2379_v3  ;;  %p2477_p3 = por %p2476_p2, %p2475_p1 }
 0x2af   :  { %p2478_p4 = pnand %p2477_p3, %p2471_p0 }
 0x2b0   :  { %2212 = vmatmul.mubr.msk.f32.vlgmr.msra.gmra.mrb[8].mxu0 %vm75_vm0, %v2644_v19 }
 0x2b1   :  { %2214 = vmatprep.mubr.msk.f32.mxu0 %vm75_vm0, %v2649_v20 }
 0x2b4   :  { %2215 = vmatmul.mubr.msk.f32.gmra.mrb[10].mxu0 %vm75_vm0, %v2658_v22 }
 0x2b5   :  { %2225 = vmatprep.mubr.msk.f32.mxu0 %vm75_vm0, %v2609_v6 }
 0x383   :  { %v2213_v27 = vpop.f32.mrb[8].mxu0 }
 0x384   :  { %v871_v6 = vpop.f32.mrb[9].mxu0 }
 0x385   :  { %v2383_v29 = vpack.c.bf16 %v2213_v27, %v871_v6  ;;  %2239 = vmatprep.mubr.msk.f32.mxu1 %vm75_vm0, %v871_v6 }
 0x386   :  { %2240 = vmatmul.mubr.msk.f32.vlgmr.msra.gmra.mrb[8].mxu1 %vm75_vm0, %v2213_v27 }
 0x387   :  { %v2216_v32 = vpop.f32.mrb[10].mxu0  ;;  %2384 = vmatprep.subr.bf16.mxu0 %v2383_v29  ;;  %2402 = vmatpush3.bf16.msra.mxu1 %v2399_v24 }
 0x388   :  { %v881_v33 = vpop.f32.mrb[11].mxu0  ;;  %2386 = vmatpush3.bf16.msra.mxu0 %v2383_v29  ;;  %2404 = vmatprep.subr.bf16.mxu1 %v2403_v28 }
 0x389   :  { %v2387_v34 = vpack.c.bf16 %v2216_v32, %v881_v33  ;;  %2242 = vmatprep.mubr.msk.f32.mxu1 %vm75_vm0, %v881_v33 }
 0x38a   :  { %2243 = vmatmul.mubr.msk.f32.gmra.mrb[10].mxu1 %vm75_vm0, %v2216_v32 }
 0x38b   :  { %2388 = vmatprep.subr.bf16.mxu0 %v2387_v34  ;;  %2406 = vmatpush3.bf16.msra.mxu1 %v2403_v28 }
 0x38c   :  { %2253 = vmatprep.mubr.msk.f32.mxu1 %vm75_vm0, %v2754_v15  ;;  %2390 = vmatpush3.bf16.msra.mxu0 %v2387_v34  ;;  %v1553_v34 = vld [vmem:[%s2930_s10] sm:$0xff] }
 0x38d   :  { %2408 = vmatprep.subr.bf16.mxu1 %v2407_v35 }
 0x38e   :  { %2254 = vmatmul.mubr.msk.f32.vlgmr.msra.gmra.mrb[8].mxu1 %vm75_vm0, %v2751_v13 }
 0x38f   :  { %2226 = vmatmul.mubr.msk.f32.vlgmr.msra.gmra.mrb[12].mxu0 %vm75_vm0, %v2644_v19  ;;  %2256 = vmatprep.mubr.msk.f32.mxu1 %vm75_vm0, %v2765_v21 }
 0x390   :  { %2228 = vmatprep.mubr.msk.f32.mxu0 %vm75_vm0, %v2649_v20  ;;  %2410 = vmatpush3.bf16.msra.mxu1 %v2407_v35  ;;  %v1956_v20 = vld [vmem:[%s2922_s2 + $0x40] sm:$0xff]  ;;  %v1554_v35 = vld [vmem:[%s2930_s10 + $0x8] sm:$0xff] }
 0x391   :  { %2412 = vmatprep.subr.bf16.mxu1 %v2411_v38  ;;  %v2431_v36 = vpack.c.bf16 %v1554_v35, %v1553_v34  ;;  %v1814_v35 = vld [vmem:[#allocation2] sm:$0x1] }
 0x392   :  { %2257 = vmatmul.mubr.msk.f32.gmra.mrb[10].mxu1 %vm75_vm0, %v2761_v18 }
 0x393   :  { %2229 = vmatmul.mubr.msk.f32.gmra.mrb[14].mxu0 %vm75_vm0, %v2658_v22  ;;  %v1957_v22 = vld [vmem:[%s2922_s2 + $0x48] sm:$0xff] }
 0x394   :  { %2414 = vmatpush3.bf16.msra.mxu1 %v2411_v38  ;;  %v2415_v42 = vpack.c.bf16 %v1957_v22, %v1956_v20 }
 0x396   :  { %2416 = vmatprep.subr.bf16.mxu0 %v2415_v42 }
 0x397   :  { %2418 = vmatpush3.bf16.msra.mxu0 %v2415_v42 }
 0x398   :  { %2420 = vmatprep.subr.bf16.mxu0 %v2419_v45 }
 0x39b   :  { %2422 = vmatpush3.bf16.msra.mxu0 %v2419_v45 }
 0x39c   :  { %2424 = vmatprep.subr.bf16.mxu0 %v2423_v12 }
 0x462   :  { %v2227_v39 = vpop.f32.mrb[12].mxu0 }
 0x463   :  { %v956_v40 = vpop.f32.mrb[13].mxu0 }
 0x464   :  { %2267 = vmatprep.mubr.msk.f32.mxu1 %vm75_vm0, %v956_v40 }
 0x465   :  { %2268 = vmatmul.mubr.msk.f32.vlgmr.msra.gmra.mrb[8].mxu1 %vm75_vm0, %v2227_v39 }
 0x466   :  { %v2230_v19 = vpop.f32.mrb[14].mxu0 }
 0x467   :  { %v966_v41 = vpop.f32.mrb[15].mxu0 }
 0x468   :  { %2270 = vmatprep.mubr.msk.f32.mxu1 %vm75_vm0, %v966_v41 }
 0x469   :  { %2271 = vmatmul.mubr.msk.f32.gmra.mrb[10].mxu1 %vm75_vm0, %v2230_v19 }
 0x538   :  { %v2269_v47 = vpop.f32.mrb[8].mxu1 }
 0x539   :  { %v1280_v48 = vadd.f32 %v2269_v47, %v1951_v46  ;;  %v1248_v49 = vpop.f32.mrb[9].mxu1 }
 0x53a   :  { %v1279_v51 = vadd.f32 %v1951_v46, %v1248_v49 }
 0x53b   :  { %v1284_v52 = vadd.f32 %v1280_v48, %v2751_v13  ;;  %v1435_v13 = vld [vmem:[%s2928_s8 + $0x10] sm:$0xff] }
 0x53c   :  { %v1283_v53 = vadd.f32 %v1279_v51, %v2754_v15  ;;  %v2272_v54 = vpop.f32.mrb[10].mxu1  ;;  %v2427_v15 = vpack.c.bf16 %v1436_v14, %v1435_v13  ;;  %v1672_v51 = vld [vmem:[%s2932_s12] sm:$0xff] }
 0x53d   :  { %v1296_v55 = vmul.f32 %v1953_v50, %v1284_v52  ;;  %v1282_v57 = vadd.f32 %v2272_v54, %v1951_v46  ;;  %v1258_v58 = vpop.f32.mrb[11].mxu1  ;;  %2311 = vmatprep.subr.mxu1 %v1672_v51  ;;  %v1971_v52 = vld [vmem:[%s2931_s11] ss:$0 sm:$0xff] }
 0x53e   :  { %v1295_v59 = vmul.f32 %v1953_v50, %v1283_v53  ;;  %v1281_v60 = vadd.f32 %v1951_v46, %v1258_v58  ;;  %2312 = vmatpush3.msra.mxu1 %v1672_v51 }
 0x53f   :  { %v1286_v61 = vadd.f32 %v1282_v57, %v2761_v18  ;;  %v1308_v0 = vadd.f32 %v1955_v56, %v1296_v55  ;;  %v1965_v18 = vld [vmem:[%s2923_s3 + $0x2] ss:$0 sm:$0xff] }
 0x540   :  { %v1307_v62 = vadd.f32 %v1955_v56, %v1295_v59  ;;  %v1285_v63 = vadd.f32 %v1281_v60, %v2765_v21 }
 0x541   :  { %v1298_v4 = vmul.f32 %v1953_v50, %v1286_v61 }
 0x542   :  { %v1297_v7 = vmul.f32 %v1953_v50, %v1285_v63  ;;  %2281 = vmatprep.mubr.msk.f32.mxu0 %vm75_vm0, %v1307_v62 }
 0x543   :  { %2282 = vmatmul.mubr.msk.f32.vlgmr.msra.gmra.mrb[0].mxu0 %vm75_vm0, %v1308_v0  ;;  %v1310_v9 = vadd.f32 %v1955_v56, %v1298_v4 }
 0x544   :  { %v1309_v8 = vadd.f32 %v1955_v56, %v1297_v7  ;;  %2426 = vmatpush3.bf16.msra.mxu0 %v2423_v12 }
 0x545   :  { %2428 = vmatprep.subr.bf16.mxu0 %v2427_v15 }
 0x546   :  { %2284 = vmatprep.mubr.msk.f32.mxu0 %vm75_vm0, %v1309_v8 }
 0x547   :  { %2285 = vmatmul.mubr.msk.f32.gmra.mrb[2].mxu0 %vm75_vm0, %v1310_v9 }
 0x548   :  { %2430 = vmatpush3.bf16.msra.mxu0 %v2427_v15 }
 0x549   :  { %2432 = vmatprep.subr.bf16.mxu0 %v2431_v36 }
 0x616   :  { %v2283_v1 = vpop.f32.mrb[0].mxu0 }
 0x617   :  { %v2436_v21 = vadd.f32 %v2437_v17, %v2283_v1  ;;  %v1394_v3 = vpop.f32.mrb[1].mxu0 }
 0x618   :  { %v2438_v5 = vadd.f32 %v2437_v17, %v1394_v3 }
 0x619   :  { %v1426_v23 = vadd.f32 %v2436_v21, %v1965_v18 }
 0x61a   :  { %v1425_v24 = vadd.f32 %v2438_v5, %v1965_v18  ;;  %v2286_v25 = vpop.f32.mrb[2].mxu0 }
 0x61b   :  { %v2440_v26 = vadd.f32 %v2437_v17, %v2286_v25  ;;  %v1404_v27 = vpop.f32.mrb[3].mxu0  ;;  %v1430_v29 = vmax.f32 %v1426_v23, 0.0 }
 0x61c   :  { %v1429_v6 = vmax.f32 %v1425_v24, 0.0  ;;  %v2442_v28 = vadd.f32 %v2437_v17, %v1404_v27 }
 0x61d   :  { %v1428_v30 = vadd.f32 %v2440_v26, %v1965_v18 }
 0x61e   :  { %v1427_v31 = vadd.f32 %v2442_v28, %v1965_v18  ;;  %2295 = vmatprep.mubr.msk.f32.mxu0 %vm75_vm0, %v1429_v6 }
 0x61f   :  { %2296 = vmatmul.mubr.msk.f32.vlgmr.msra.gmra.mrb[16].mxu0 %vm75_vm0, %v1430_v29  ;;  %v1432_v33 = vmax.f32 %v1428_v30, 0.0 }
 0x620   :  { %v1431_v32 = vmax.f32 %v1427_v31, 0.0  ;;  %2434 = vmatpush3.bf16.msra.mxu0 %v2431_v36  ;;  %v1820_v36 = vlaneseq }
 0x622   :  { %2298 = vmatprep.mubr.msk.f32.mxu0 %vm75_vm0, %v1431_v32 }
 0x623   :  { %2299 = vmatmul.mubr.msk.f32.gmra.mrb[18].mxu0 %vm75_vm0, %v1432_v33  ;;  %vm1847_vm0 = vcmask 130112  }
 0x6f2   :  { %v2297_v38 = vpop.f32.mrb[16].mxu0 }
 0x6f3   :  { %v1528_v39 = vadd.f32 %v2297_v38, %v1966_v37  ;;  %v1522_v40 = vpop.f32.mrb[17].mxu0  ;;  %v1821_v38 = vshrl.u32 %v1820_v36, 7 }
 0x6f4   :  { %v1523_v19 = vadd.f32 %v1966_v37, %v1522_v40 }
 0x6f5   :  { %v1546_v41 = vmul.f32 0.01, %v1528_v39  ;;  %vm1542_vm1 = vcmp.gt.f32.partialorder %v1528_v39, 0.0 }
 0x6f6   :  { %vm1541_vm2 = vcmp.gt.f32.partialorder %v1523_v19, 0.0  ;;  %v1545_v20 = vmul.f32 0.01, %v1523_v19  ;;  %v2300_v22 = vpop.f32.mrb[18].mxu0 }
 0x6f7   :  { %v1538_v42 = vadd.f32 %v2300_v22, %v1966_v37  ;;  %v1532_v43 = vpop.f32.mrb[19].mxu0  ;;  %v1550_v46 = vsel %vm1542_vm1, %v1528_v39, %v1546_v41  ;;  %v1837_v39 = vand.u32 127, %v1820_v36  ;;  %v1822_v41 = vsub.s32 0, %v1821_v38 }
 0x6f8   :  { %v1533_v44 = vadd.f32 %v1966_v37, %v1532_v43  ;;  %v1549_v45 = vsel %vm1541_vm2, %v1523_v19, %v1545_v20  ;;  %vm1854_vm1 = vcmask 195712   ;;  %vm1861_vm2 = vcmask 261312  }
 0x6f9   :  { %v1548_v47 = vmul.f32 0.01, %v1538_v42  ;;  %2305 = vmatprep.mubr.msk.f32.mxu0 %vm1562_vm3, %v1549_v45  ;;  %vm1544_vm4 = vcmp.gt.f32.partialorder %v1538_v42, 0.0  ;;  %v1842_v20 = vadd.s32 4294967288, %v1837_v39  ;;  %v1849_v22 = vadd.s32 4294967280, %v1837_v39 }
 0x6fa   :  { %vm1543_vm5 = vcmp.gt.f32.partialorder %v1533_v44, 0.0  ;;  %v1547_v48 = vmul.f32 0.01, %v1533_v44  ;;  %2306 = vmatmul.mubr.msk.f32.vlgmr.msra.gmra.mrb[20].mxu0 %vm1562_vm3, %v1550_v46  ;;  %v1856_v43 = vadd.s32 4294967272, %v1837_v39  ;;  %v1840_v46 = vsub.s32 %v1837_v39, %v1821_v38 }
 0x6fb   :  { %v1552_v50 = vsel %vm1544_vm4, %v1538_v42, %v1548_v47  ;;  %v1845_v47 = vsub.s32 %v1842_v20, %v1821_v38 }
 0x6fc   :  { %v1551_v49 = vsel %vm1543_vm5, %v1533_v44, %v1547_v48  ;;  %v1852_v48 = vsub.s32 %v1849_v22, %v1821_v38 }
 0x6fd   :  { %2308 = vmatprep.mubr.msk.f32.mxu0 %vm1562_vm3, %v1551_v49 }
 0x6fe   :  { %2309 = vmatmul.mubr.msk.f32.gmra.mrb[22].mxu0 %vm1562_vm3, %v1552_v50  ;;  %vm1864_vm3 = vcmask 253952  }
 0x7cd   :  { %v2307_v53 = vpop.f32.mrb[20].mxu0 }
 0x7ce   :  { %v1647_v54 = vadd.f32 %v2307_v53, %v1971_v52  ;;  %v1641_v55 = vpop.f32.mrb[21].mxu0  ;;  %v1859_v53 = vsub.s32 %v1856_v43, %v1821_v38 }
 0x7cf   :  { %v1642_v56 = vadd.f32 %v1971_v52, %v1641_v55 }
 0x7d0   :  { %v1665_v57 = vmul.f32 0.01, %v1647_v54  ;;  %vm1661_vm6 = vcmp.gt.f32.partialorder %v1647_v54, 0.0 }
 0x7d1   :  { %vm1660_vm7 = vcmp.gt.f32.partialorder %v1642_v56, 0.0  ;;  %v1664_v58 = vmul.f32 0.01, %v1642_v56  ;;  %v2310_v59 = vpop.f32.mrb[22].mxu0 }
 0x7d2   :  { %v1657_v60 = vadd.f32 %v2310_v59, %v1971_v52  ;;  %v1651_v61 = vpop.f32.mrb[23].mxu0  ;;  %v1669_v0 = vsel %vm1661_vm6, %v1647_v54, %v1665_v57 }
 0x7d3   :  { %v1652_v62 = vadd.f32 %v1971_v52, %v1651_v61  ;;  %v1668_v63 = vsel %vm1660_vm7, %v1642_v56, %v1664_v58 }
 0x7d4   :  { %v1667_v4 = vmul.f32 0.01, %v1657_v60  ;;  %2313 = vmatprep.mubr.msk.f32.mxu1 %vm1680_vm8, %v1668_v63  ;;  %vm1663_vm9 = vcmp.gt.f32.partialorder %v1657_v60, 0.0 }
 0x7d5   :  { %vm1662_vm10 = vcmp.gt.f32.partialorder %v1652_v62, 0.0  ;;  %v1666_v7 = vmul.f32 0.01, %v1652_v62  ;;  %2314 = vmatmul.mubr.msk.f32.vlgmr.msra.gmra.mrb[12].mxu1 %vm1680_vm8, %v1669_v0 }
 0x7d6   :  { %v1671_v9 = vsel %vm1663_vm9, %v1657_v60, %v1667_v4 }
 0x7d7   :  { %v1670_v8 = vsel %vm1662_vm10, %v1652_v62, %v1666_v7 }
 0x7d8   :  { %2316 = vmatprep.mubr.msk.f32.mxu1 %vm1680_vm8, %v1670_v8 }
 0x7d9   :  { %2317 = vmatmul.mubr.msk.f32.gmra.mrb[14].mxu1 %vm1680_vm8, %v1671_v9 }
 0x8a8   :  { %v2315_v12 = vpop.f32.mrb[12].mxu1 }
 0x8a9   :  { %v1765_v13 = vadd.f32 %v2315_v12, %v1976_v11  ;;  %v1759_v14 = vpop.f32.mrb[13].mxu1 }
 0x8aa   :  { %v1760_v15 = vadd.f32 %v1976_v11, %v1759_v14 }
 0x8ab   :  { %v1783_v2 = vmul.f32 0.01, %v1765_v13  ;;  %vm1779_vm11 = vcmp.gt.f32.partialorder %v1765_v13, 0.0 }
 0x8ac   :  { %vm1778_vm12 = vcmp.gt.f32.partialorder %v1760_v15, 0.0  ;;  %v1782_v17 = vmul.f32 0.01, %v1760_v15  ;;  %v2318_v1 = vpop.f32.mrb[14].mxu1 }
 0x8ad   :  { %v1775_v18 = vadd.f32 %v2318_v1, %v1976_v11  ;;  %v1769_v21 = vpop.f32.mrb[15].mxu1  ;;  %v1787_v3 = vsel %vm1779_vm11, %v1765_v13, %v1783_v2 }
 0x8ae   :  { %v1770_v5 = vadd.f32 %v1976_v11, %v1769_v21  ;;  %v1798_v23 = vmul.f32 %v1981_v16, %v1787_v3  ;;  %v1786_v24 = vsel %vm1778_vm12, %v1760_v15, %v1782_v17 }
 0x8af   :  { %vm1781_vm14 = vcmp.gt.f32.partialorder %v1775_v18, 0.0  ;;  %v1785_v25 = vmul.f32 0.01, %v1775_v18  ;;  %v1797_v6 = vmul.f32 %v1981_v16, %v1786_v24 }
 0x8b0   :  { %v1784_v26 = vmul.f32 0.01, %v1770_v5  ;;  %v1805_v27 = vsel %vm1801_vm13, %v1798_v23, 0.0  ;;  %vm1780_vm15 = vcmp.gt.f32.partialorder %v1770_v5, 0.0 }
 0x8b1   :  { %1806 = vadd.xlane.f32.xlu0 %v1805_v27  ;;  %v1789_v29 = vsel %vm1781_vm14, %v1775_v18, %v1785_v25  ;;  %v1802_v31 = vsel %vm1801_vm13, %v1797_v6, 0.0 }
 0x8b2   :  { %v1788_v28 = vsel %vm1780_vm15, %v1770_v5, %v1784_v26  ;;  %v1800_v33 = vmul.f32 %v1981_v16, %v1789_v29 }
 0x8b3   :  { %v1799_v30 = vmul.f32 %v1981_v16, %v1788_v28 }
 0x8b4   :  { %v1811_v34 = vsel %vm1801_vm13, %v1800_v33, 0.0 }
 0x8b5   :  { %1803 = vadd.xlane.f32.xlu0 %v1802_v31  ;;  %v1808_v32 = vsel %vm1801_vm13, %v1799_v30, 0.0 }
 0x8b6   :  { %1809 = vadd.xlane.f32.xlu1 %v1808_v32 }
 0x8ba   :  { %1812 = vadd.xlane.f32.xlu1 %v1811_v34 }
 0x8cb   :  { %1817 = vperm.xlu0 %2469, %v1814_v35  }
 0x93e   :  { %v1807_v37 = vpop.xlane.xlu0 %1806 }
 0x942   :  { %v1804_v40 = vpop.xlane.xlu0 %1803 }
 0x943   :  { %v1810_v19 = vpop.xlane.xlu1 %1809 }
 0x947   :  { %v1813_v45 = vpop.xlane.xlu1 %1812 }
 0x94a   :  { %v1818_v42 = vpop.permute.xlu0 %1817 }
 0x94b   :  { %v1823_v44 = vrot.slane %v1818_v42, %v1822_v41 }
 0x94d   :  { %v1824_v49 = vadd.f32 %v1823_v44, %v1804_v40  ;;  %v1825_v50 = vadd.f32 %v1823_v44, %v1807_v37  ;;  %v1826_v51 = vadd.f32 %v1823_v44, %v1810_v19  ;;  %v1827_v52 = vadd.f32 %v1823_v44, %v1813_v45 }
 0x94f   :  { %v1828_v54 = vmax.f32 %v1824_v49, 0.0  ;;  %v1829_v55 = vmax.f32 %v1825_v50, 0.0  ;;  %v1830_v56 = vmax.f32 %v1826_v51, 0.0  ;;  %v1831_v57 = vmax.f32 %v1827_v52, 0.0 }
 0x951   :  { %v1841_v58 = vrot.slane %v1828_v54, %v1840_v46  ;;  %v1846_v59 = vrot.slane %v1829_v55, %v1845_v47  ;;  %v1853_v60 = vrot.slane %v1830_v56, %v1852_v48  ;;  %v1860_v62 = vrot.slane %v1831_v57, %v1859_v53 }
 0x953   :  { %v1848_v61 = vsel %vm1847_vm0, %v1846_v59, %v1841_v58 }
 0x954   :  { %v1855_v63 = vsel %vm1854_vm1, %v1853_v60, %v1848_v61 }
 0x955   :  { %v1862_v0 = vsel %vm1861_vm2, %v1860_v62, %v1855_v63 }
 0x956   :  { %1865 = vst.msk [vmem:[#allocation3] sm:$0x1] %vm1864_vm3, %v1862_v0 }
 0x957   :  { %2481 = shalt.err (!%p2478_p4)
}
 0x958   :  { %s2482_s23 = scalar_lea.hbm %s2936_s16, 16 }
 0x959   :  { %p2483_p5 = scmp.ne.s32.totalorder %s2936_s16, %s2482_s23  ;;  %p2486_p6 = scmp.lt.u32.totalorder %s2482_s23, %s2936_s16 }
 0x95b   :  { %p2488_p7 = pnand %p2486_p6, %p2483_p5 }
 0x95d   :  { %2491 = shalt.err (!%p2488_p7)
}
 0x95e   :  { %1875 = dma.vmem_to_hbm [thread:$0]  %s1873_s14, 16, %s2936_s16, [#allocation4]  }
 0x95f   :  { %2492 = dma.done.wait [#allocation4], 16  }
 0x960   :  { %2493 = vsyncadd [#allocation4], 4294967280 }
 0x961   :  { %1879 = vsyncpa [#allocation4], 1 }

</bundles_post_ra>
